<compile_context>
chip_gen: v5e
topology: v5e:2x2
jax: 0.10.0
libtpu: 0.0.40
codegen_flags: <defaults>
</compile_context>

<pallas_src>
import functools

import jax
import jax.numpy as jnp
from jax import lax
from jax.experimental import pallas as pl
from jax.experimental.pallas import tpu as pltpu


_MAX_BLOCK_ROWS = 4096      # upper bound on packed-batch rows per grid step
_MAX_BLOCK_ELEMS = 1 << 20  # bound tb*W so f32 intermediates stay within VMEM limits
_MAX_LANES = 1024           # target lane width after folding batch rows onto lanes


def _round_up(x, m):
    return ((x + m - 1) // m) * m


def _round_down(x, m):
    return (x // m) * m


# ---------------------------------------------------------------------------
# Lazy wire-format / hardware probes (no device init at import time)
# ---------------------------------------------------------------------------
@functools.lru_cache(maxsize=None)
def _bf16_pair_elem0_in_low_bits() -> bool:
    """True if lax.bitcast_convert_type packs bf16 element 0 into the low 16 bits."""
    probe = jnp.array([[1.0, 2.0]], dtype=jnp.bfloat16)  # 1.0 -> 0x3F80, 2.0 -> 0x4000
    packed = int(jax.device_get(lax.bitcast_convert_type(probe, jnp.uint32))[0])
    return (packed & 0xFFFF) == 0x3F80


@functools.lru_cache(maxsize=None)
def _vmem_limit_bytes() -> int:
    """~3/4 of per-core VMEM (48 MiB on v7x's 64 MiB, capped at 64 MiB elsewhere)."""
    try:
        cap = int(pltpu.get_tpu_info().vmem_capacity_bytes)
        return max(32 << 20, min((3 * cap) // 4, 64 << 20))
    except Exception:
        return 48 << 20


# ---------------------------------------------------------------------------
# Kernel
# ---------------------------------------------------------------------------
def _mtl_loss_kernel(x_ref, y_ref, s_nll_ref, s_ynll_ref, s_y_ref, *,
                     nc, tiles_per_core, block_rows, total_rows, elem0_low):
    """One grid step: accumulate per-lane sums of nll, y*nll and y.

    x_ref  : (block_rows, W) uint32 -- packed (bf16 class0 | bf16 class1) logits
    y_ref  : (block_rows, W) int8   -- labels in {0, 1}
    s_*_ref: (8, W) f32             -- resident accumulators; all 8 sublane rows
                                       hold identical copies of the per-lane sum.
    """
    i = pl.program_id(1)   # batch tile within this core ("arbitrary")

    @pl.when(i == 0)
    def _init():
        s_nll_ref[...] = jnp.zeros_like(s_nll_ref)
        s_ynll_ref[...] = jnp.zeros_like(s_ynll_ref)
        s_y_ref[...] = jnp.zeros_like(s_y_ref)

    # Unpack the two bf16 logits and upcast to f32 (bf16 -> f32 == bits << 16).
    p = x_ref[...]
    lo = pltpu.bitcast(p << 16, jnp.float32)                     # low half  -> f32
    hi = pltpu.bitcast(p & jnp.uint32(0xFFFF0000), jnp.float32)  # high half -> f32
    x0, x1 = (lo, hi) if elem0_low else (hi, lo)

    y_f = y_ref[...].astype(jnp.float32)                         # {0.0, 1.0}

    # Closed-form binary CE: nll = softplus(x_other - x_true), numerically stable.
    d = (x0 - x1) * (2.0 * y_f - 1.0)
    nll = jnp.maximum(d, 0.0) + jnp.log(1.0 + jnp.exp(-jnp.abs(d)))
    ynll = y_f * nll

    # Row reduction on the idle MXU: dot(ones(8, tb), t) -> (8, W), every row is
    # the per-lane column sum (HIGHEST precision keeps the f32 accuracy).  Tiny
    # tiles fall back to a VPU sum broadcast across sublanes.
    use_mxu = block_rows >= 8
    ones = jnp.ones((8, block_rows), jnp.float32) if use_mxu else None

    def row_totals(t):
        if use_mxu:
            return jnp.dot(ones, t, precision=lax.Precision.HIGHEST,
                           preferred_element_type=jnp.float32)
        s = jnp.sum(t, axis=0, keepdims=True)
        return jnp.broadcast_to(s, (8, t.shape[1]))

    def accumulate(nll_t, ynll_t, y_t):
        s_nll_ref[...] += row_totals(nll_t)
        s_ynll_ref[...] += row_totals(ynll_t)
        s_y_ref[...] += row_totals(y_t)

    num_tiles = nc * tiles_per_core
    tail_rows = total_rows - (num_tiles - 1) * block_rows   # static Python int

    if tail_rows == block_rows:
        # No partial tile anywhere: hot loop stays completely unmasked.
        accumulate(nll, ynll, y_f)
    else:
        # Only the globally-last tile carries padded (garbage) rows; gate the
        # masking there so interior tiles skip the iota/compare/where entirely.
        c = pl.program_id(0)
        is_tail = jnp.logical_and(c == nc - 1, i == tiles_per_core - 1)

        @pl.when(jnp.logical_not(is_tail))
        def _interior():
            accumulate(nll, ynll, y_f)

        @pl.when(is_tail)
        def _tail():
            # Mask every term (not just one factor) so garbage padding (possible
            # NaN/Inf from random bf16 bit patterns) never reaches the sums.
            valid = lax.broadcasted_iota(jnp.int32, nll.shape, 0) < tail_rows
            accumulate(jnp.where(valid, nll, 0.0),
                       jnp.where(valid, ynll, 0.0),
                       jnp.where(valid, y_f, 0.0))


# ---------------------------------------------------------------------------
# Wrapper helpers
# ---------------------------------------------------------------------------
def _pack_factor(batch, heads):
    """Divisor r of `batch` with r*heads <= _MAX_LANES; prefer (r*heads) % 128 == 0."""
    cap = max(1, _MAX_LANES // max(heads, 1))
    divisors = [r for r in range(1, min(batch, cap) + 1) if batch % r == 0]
    lane_aligned = [r for r in divisors if (r * heads) % 128 == 0]
    return max(lane_aligned) if lane_aligned else max(divisors)


def _choose_tiling(rows, lane_width, max_block_rows):
    """Pick (tb, nc, tiles_per_core) with nc*tiles_per_core*tb covering `rows` exactly
    once (no clamped/duplicated tile); nc=2 only when the tile count splits evenly."""
    elem_cap = max(32, _round_down(max(_MAX_BLOCK_ELEMS // max(lane_width, 1), 32), 32))
    limit = max(32, min(_MAX_BLOCK_ROWS, _round_down(max_block_rows, 32), elem_cap))
    if rows <= limit:
        return rows, 1, 1

    tb = limit
    num_tiles = pl.cdiv(rows, tb)
    # Prefer an even tile count so the leading "parallel" axis splits cleanly
    # across v7x's two TensorCores (serialized, but harmless, on 1-TC chips).
    if num_tiles % 2 and num_tiles > 1:
        alt = _round_up(pl.cdiv(rows, num_tiles + 1), 32)
        if 32 <= alt <= tb and pl.cdiv(rows, alt) % 2 == 0:
            tb = alt
            num_tiles = pl.cdiv(rows, alt)
    nc = 2 if (num_tiles >= 2 and num_tiles % 2 == 0) else 1
    return tb, nc, num_tiles // nc


# ---------------------------------------------------------------------------
# Wrapper
# ---------------------------------------------------------------------------
def mtl_loss(X, Y, class_weights, *, max_block_rows=_MAX_BLOCK_ROWS):
    """X: (B, H, 2) logits (bf16 wire dtype), Y: (B, H) labels, class_weights: (H, 2)."""
    B, H, C = X.shape
    assert C == 2, "MTLLoss heads are binary (2 classes)"

    xb = jnp.asarray(X, jnp.bfloat16)     # bf16 on the wire (upcast to f32 in-kernel)
    y8 = jnp.asarray(Y, jnp.int8)         # int8 labels on the wire
    cw = jnp.asarray(class_weights, jnp.float32)

    # Pack the two class logits of each (n, h) into one uint32 lane and fold R
    # batch rows onto lanes; both are free contiguous re-views of the input.
    R = _pack_factor(B, H)
    W = R * H
    rows = B // R
    packed = lax.bitcast_convert_type(xb, jnp.uint32).reshape(rows, W)
    labels = y8.reshape(rows, W)

    tb, nc, tiles_per_core = _choose_tiling(rows, W, max_block_rows)

    kernel = functools.partial(
        _mtl_loss_kernel,
        nc=nc, tiles_per_core=tiles_per_core, block_rows=tb, total_rows=rows,
        elem0_low=_bf16_pair_elem0_in_low_bits())

    def data_map(c, i):
        return (c * tiles_per_core + i, 0)

    acc_shape = jax.ShapeDtypeStruct((nc, 8, W), jnp.float32)
    acc_spec = pl.BlockSpec((None, 8, W), lambda c, i: (c, 0, 0))

    s_nll, s_ynll, s_y = pl.pallas_call(
        kernel,
        out_shape=(acc_shape, acc_shape, acc_shape),
        grid_spec=pltpu.PrefetchScalarGridSpec(
            num_scalar_prefetch=0,
            grid=(nc, tiles_per_core),
            in_specs=[
                pl.BlockSpec((tb, W), data_map),
                pl.BlockSpec((tb, W), data_map),
            ],
            out_specs=(acc_spec, acc_spec, acc_spec),
        ),
        compiler_params=pltpu.CompilerParams(
            dimension_semantics=("parallel", "arbitrary"),
            vmem_limit_bytes=_vmem_limit_bytes(),
        ),
        cost_estimate=pl.CostEstimate(
            flops=64 * B * H,
            transcendentals=2 * B * H,
            bytes_accessed=B * H * 5 + 3 * nc * 8 * W * 4,
        ),
    )(packed, labels)

    # Exact f32 epilogue: per-lane sums (row 0 of each (8, W) accumulator) ->
    # per-head weighted CE, then head mean.  Lane j maps to head j % H.
    def per_head(acc):
        return acc[:, 0, :].sum(axis=0).reshape(R, H).sum(axis=0)   # (H,)

    S_nll = per_head(s_nll)
    S_ynll = per_head(s_ynll)
    S_y = per_head(s_y)
    w0, w1 = cw[:, 0], cw[:, 1]
    num_h = w0 * (S_nll - S_ynll) + w1 * S_ynll     # sum_n w[y] * nll
    den_h = w0 * (B - S_y) + w1 * S_y               # sum_n w[y]
    return jnp.mean(num_h / den_h)


# ---------------------------------------------------------------------------
# Pure-JAX reference mirroring the PyTorch forward
# ---------------------------------------------------------------------------
def _reference_loss(X, Y, class_weights):
    Xf = jnp.asarray(X, jnp.float32)
    Yi = jnp.asarray(Y, jnp.int32)
    cw = jnp.asarray(class_weights, jnp.float32)
    losses = []
    for h in range(Xf.shape[1]):
        logits = Xf[:, h, :]                                   # (B, 2)
        lbl = Yi[:, h]                                         # (B,)
        logp = jax.nn.log_softmax(logits, axis=-1)
        picked = jnp.take_along_axis(logp, lbl[:, None], axis=-1)[:, 0]
        w = cw[h][lbl]
        losses.append(jnp.sum(-w * picked) / jnp.sum(w))
    return jnp.mean(jnp.stack(losses))


if __name__ == "__main__":
    key = jax.random.PRNGKey(0)

    def make_case(k, B, H):
        # Deterministic stand-in for data/celeba/meta.json attribute means.
        means = jnp.array([0.08 + 0.8 * (i + 1) / (H + 1) for i in range(H)],
                          dtype=jnp.float32)                                   # (H,)
        class_weights = jnp.stack([1.0 / (1.0 - means), 1.0 / means], axis=-1) # (H, 2)
        kx, ky = jax.random.split(k)
        X = jax.random.normal(kx, (B, H, 2), dtype=jnp.float32).astype(jnp.bfloat16)
        Y = jax.random.bernoulli(ky, 0.5, (B, H)).astype(jnp.int8)
        return X, Y, class_weights

    k1, k2 = jax.random.split(key)

    # Case 1: module-sized example (B=8, 4 heads) — single tile, VPU reduce path.
    X1, Y1, cw1 = make_case(k1, 8, 4)
    out1 = jax.block_until_ready(mtl_loss(X1, Y1, cw1))
    ref1 = jax.block_until_ready(_reference_loss(X1, Y1, cw1))
    assert jnp.allclose(out1, ref1, rtol=1e-5, atol=1e-5), (out1, ref1)

    # Case 2: exercises 128-aligned lane folding (H=40 -> W=640), the two-core
    # grid split, the gated masked tail tile and the MXU row-reduction path
    # (small max_block_rows override keeps the test tiny).
    X2, Y2, cw2 = make_case(k2, 768, 40)
    out2 = jax.block_until_ready(mtl_loss(X2, Y2, cw2, max_block_rows=32))
    ref2 = jax.block_until_ready(_reference_loss(X2, Y2, cw2))
    assert jnp.allclose(out2, ref2, rtol=1e-5, atol=1e-5), (out2, ref2)

    print("KERNEL_OK")
</pallas_src>

<mosaic_0001>
module attributes {stable_mosaic.version = 11 : i64} {
  func.func @_mtl_loss_kernel(%arg0: i32, %arg1: i32, %arg2: memref<1x32xi32, #tpu.memory_space<vmem>>, %arg3: memref<1x32xi8, #tpu.memory_space<vmem>>, %arg4: memref<1x8x32xf32, #tpu.memory_space<vmem>>, %arg5: memref<1x8x32xf32, #tpu.memory_space<vmem>>, %arg6: memref<1x8x32xf32, #tpu.memory_space<vmem>>) attributes {dimension_semantics = [#tpu.dimension_semantics<parallel>, #tpu.dimension_semantics<arbitrary>], iteration_bounds = array<i64: 1, 1>, scalar_prefetch = 0 : i64, scratch_operands = 0 : i64, tpu.core_type = #tpu.core_type<tc>, window_params = [{transform_indices = @transform_0, window_bounds = array<i64: 1, 32>}, {transform_indices = @transform_1, window_bounds = array<i64: 1, 32>}, {transform_indices = @transform_2, window_bounds = array<i64: 1, 8, 32>}, {transform_indices = @transform_3, window_bounds = array<i64: 1, 8, 32>}, {transform_indices = @transform_4, window_bounds = array<i64: 1, 8, 32>}]} {
    %c0_i32 = arith.constant 0 : i32
    %0 = arith.cmpi eq, %arg1, %c0_i32 : i32
    %1 = arith.extui %0 : i1 to i32
    %c0_i32_0 = arith.constant 0 : i32
    %2 = arith.cmpi ne, %1, %c0_i32_0 : i32
    scf.if %2 {
      %cst_29 = arith.constant 0.000000e+00 : f32
      %59 = vector.broadcast %cst_29 : f32 to vector<8x32xf32>
      %c0_30 = arith.constant 0 : index
      %c0_31 = arith.constant 0 : index
      %c0_32 = arith.constant 0 : index
      %60 = vector.load %arg4[%c0_30, %c0_31, %c0_32] : memref<1x8x32xf32, #tpu.memory_space<vmem>>, vector<1x8x32xf32>
      %61 = vector.shape_cast %60 : vector<1x8x32xf32> to vector<8x32xf32>
      %62 = vector.shape_cast %59 : vector<8x32xf32> to vector<1x8x32xf32>
      tpu.vector_store %arg4[%c0_30, %c0_31, %c0_32], %62 {strides = array<i32>} : memref<1x8x32xf32, #tpu.memory_space<vmem>>, vector<1x8x32xf32>,
      %cst_33 = arith.constant 0.000000e+00 : f32
      %63 = vector.broadcast %cst_33 : f32 to vector<8x32xf32>
      %c0_34 = arith.constant 0 : index
      %c0_35 = arith.constant 0 : index
      %c0_36 = arith.constant 0 : index
      %64 = vector.load %arg5[%c0_34, %c0_35, %c0_36] : memref<1x8x32xf32, #tpu.memory_space<vmem>>, vector<1x8x32xf32>
      %65 = vector.shape_cast %64 : vector<1x8x32xf32> to vector<8x32xf32>
      %66 = vector.shape_cast %63 : vector<8x32xf32> to vector<1x8x32xf32>
      tpu.vector_store %arg5[%c0_34, %c0_35, %c0_36], %66 {strides = array<i32>} : memref<1x8x32xf32, #tpu.memory_space<vmem>>, vector<1x8x32xf32>,
      %cst_37 = arith.constant 0.000000e+00 : f32
      %67 = vector.broadcast %cst_37 : f32 to vector<8x32xf32>
      %c0_38 = arith.constant 0 : index
      %c0_39 = arith.constant 0 : index
      %c0_40 = arith.constant 0 : index
      %68 = vector.load %arg6[%c0_38, %c0_39, %c0_40] : memref<1x8x32xf32, #tpu.memory_space<vmem>>, vector<1x8x32xf32>
      %69 = vector.shape_cast %68 : vector<1x8x32xf32> to vector<8x32xf32>
      %70 = vector.shape_cast %67 : vector<8x32xf32> to vector<1x8x32xf32>
      tpu.vector_store %arg6[%c0_38, %c0_39, %c0_40], %70 {strides = array<i32>} : memref<1x8x32xf32, #tpu.memory_space<vmem>>, vector<1x8x32xf32>,
    } else {
    }
    %c0 = arith.constant 0 : index
    %c0_1 = arith.constant 0 : index
    %3 = vector.load %arg2[%c0, %c0_1] : memref<1x32xi32, #tpu.memory_space<vmem>>, vector<1x32xi32>
    %c16_i32 = arith.constant 16 : i32
    %4 = vector.broadcast %c16_i32 : i32 to vector<1x32xi32>
    %5 = arith.shli %3, %4 : vector<1x32xi32>
    %6 = tpu.bitcast %5 : vector<1x32xi32> -> vector<1x32xf32>
    %c-65536_i32 = arith.constant -65536 : i32
    %7 = vector.broadcast %c-65536_i32 : i32 to vector<1x32xi32>
    %8 = arith.andi %3, %7 : vector<1x32xi32>
    %9 = tpu.bitcast %8 : vector<1x32xi32> -> vector<1x32xf32>
    %c0_2 = arith.constant 0 : index
    %c0_3 = arith.constant 0 : index
    %10 = vector.load %arg3[%c0_2, %c0_3] : memref<1x32xi8, #tpu.memory_space<vmem>>, vector<1x32xi8>
    %11 = arith.sitofp %10 : vector<1x32xi8> to vector<1x32xf32>
    %12 = arith.subf %6, %9 : vector<1x32xf32>
    %cst = arith.constant 2.000000e+00 : f32
    %13 = vector.broadcast %cst : f32 to vector<1x32xf32>
    %14 = arith.mulf %13, %11 : vector<1x32xf32>
    %cst_4 = arith.constant 1.000000e+00 : f32
    %15 = vector.broadcast %cst_4 : f32 to vector<1x32xf32>
    %16 = arith.subf %14, %15 : vector<1x32xf32>
    %17 = arith.mulf %12, %16 : vector<1x32xf32>
    %cst_5 = arith.constant 0.000000e+00 : f32
    %18 = vector.broadcast %cst_5 : f32 to vector<1x32xf32>
    %19 = arith.maximumf %17, %18 : vector<1x32xf32>
    %20 = math.absf %17 : vector<1x32xf32>
    %cst_6 = arith.constant 0.000000e+00 : f32
    %21 = vector.broadcast %cst_6 : f32 to vector<1x32xf32>
    %22 = arith.subf %21, %20 : vector<1x32xf32>
    %23 = math.exp %22 : vector<1x32xf32>
    %cst_7 = arith.constant 1.000000e+00 : f32
    %24 = vector.broadcast %cst_7 : f32 to vector<1x32xf32>
    %25 = arith.addf %24, %23 : vector<1x32xf32>
    %26 = math.log %25 : vector<1x32xf32>
    %27 = arith.addf %19, %26 : vector<1x32xf32>
    %28 = arith.mulf %11, %27 : vector<1x32xf32>
    %c0_8 = arith.constant 0 : index
    %c0_9 = arith.constant 0 : index
    %c0_10 = arith.constant 0 : index
    %29 = vector.load %arg4[%c0_8, %c0_9, %c0_10] : memref<1x8x32xf32, #tpu.memory_space<vmem>>, vector<1x8x32xf32>
    %30 = vector.shape_cast %29 : vector<1x8x32xf32> to vector<8x32xf32>
    %cst_11 = arith.constant dense<0.000000e+00> : vector<32xf32>
    %31 = vector.multi_reduction <add>, %27, %cst_11 [0] : vector<1x32xf32> to vector<32xf32>
    %32 = vector.shape_cast %31 : vector<32xf32> to vector<1x32xf32>
    %33 = vector.shape_cast %32 : vector<1x32xf32> to vector<1x32xf32>
    %34 = vector.broadcast %33 : vector<1x32xf32> to vector<8x32xf32>
    %35 = arith.addf %30, %34 : vector<8x32xf32>
    %c0_12 = arith.constant 0 : index
    %c0_13 = arith.constant 0 : index
    %c0_14 = arith.constant 0 : index
    %36 = vector.load %arg4[%c0_12, %c0_13, %c0_14] : memref<1x8x32xf32, #tpu.memory_space<vmem>>, vector<1x8x32xf32>
    %37 = vector.shape_cast %36 : vector<1x8x32xf32> to vector<8x32xf32>
    %38 = vector.shape_cast %35 : vector<8x32xf32> to vector<1x8x32xf32>
    tpu.vector_store %arg4[%c0_12, %c0_13, %c0_14], %38 {strides = array<i32>} : memref<1x8x32xf32, #tpu.memory_space<vmem>>, vector<1x8x32xf32>,
    %c0_15 = arith.constant 0 : index
    %c0_16 = arith.constant 0 : index
    %c0_17 = arith.constant 0 : index
    %39 = vector.load %arg5[%c0_15, %c0_16, %c0_17] : memref<1x8x32xf32, #tpu.memory_space<vmem>>, vector<1x8x32xf32>
    %40 = vector.shape_cast %39 : vector<1x8x32xf32> to vector<8x32xf32>
    %cst_18 = arith.constant dense<0.000000e+00> : vector<32xf32>
    %41 = vector.multi_reduction <add>, %28, %cst_18 [0] : vector<1x32xf32> to vector<32xf32>
    %42 = vector.shape_cast %41 : vector<32xf32> to vector<1x32xf32>
    %43 = vector.shape_cast %42 : vector<1x32xf32> to vector<1x32xf32>
    %44 = vector.broadcast %43 : vector<1x32xf32> to vector<8x32xf32>
    %45 = arith.addf %40, %44 : vector<8x32xf32>
    %c0_19 = arith.constant 0 : index
    %c0_20 = arith.constant 0 : index
    %c0_21 = arith.constant 0 : index
    %46 = vector.load %arg5[%c0_19, %c0_20, %c0_21] : memref<1x8x32xf32, #tpu.memory_space<vmem>>, vector<1x8x32xf32>
    %47 = vector.shape_cast %46 : vector<1x8x32xf32> to vector<8x32xf32>
    %48 = vector.shape_cast %45 : vector<8x32xf32> to vector<1x8x32xf32>
    tpu.vector_store %arg5[%c0_19, %c0_20, %c0_21], %48 {strides = array<i32>} : memref<1x8x32xf32, #tpu.memory_space<vmem>>, vector<1x8x32xf32>,
    %c0_22 = arith.constant 0 : index
    %c0_23 = arith.constant 0 : index
    %c0_24 = arith.constant 0 : index
    %49 = vector.load %arg6[%c0_22, %c0_23, %c0_24] : memref<1x8x32xf32, #tpu.memory_space<vmem>>, vector<1x8x32xf32>
    %50 = vector.shape_cast %49 : vector<1x8x32xf32> to vector<8x32xf32>
    %cst_25 = arith.constant dense<0.000000e+00> : vector<32xf32>
    %51 = vector.multi_reduction <add>, %11, %cst_25 [0] : vector<1x32xf32> to vector<32xf32>
    %52 = vector.shape_cast %51 : vector<32xf32> to vector<1x32xf32>
    %53 = vector.shape_cast %52 : vector<1x32xf32> to vector<1x32xf32>
    %54 = vector.broadcast %53 : vector<1x32xf32> to vector<8x32xf32>
    %55 = arith.addf %50, %54 : vector<8x32xf32>
    %c0_26 = arith.constant 0 : index
    %c0_27 = arith.constant 0 : index
    %c0_28 = arith.constant 0 : index
    %56 = vector.load %arg6[%c0_26, %c0_27, %c0_28] : memref<1x8x32xf32, #tpu.memory_space<vmem>>, vector<1x8x32xf32>
    %57 = vector.shape_cast %56 : vector<1x8x32xf32> to vector<8x32xf32>
    %58 = vector.shape_cast %55 : vector<8x32xf32> to vector<1x8x32xf32>
    tpu.vector_store %arg6[%c0_26, %c0_27, %c0_28], %58 {strides = array<i32>} : memref<1x8x32xf32, #tpu.memory_space<vmem>>, vector<1x8x32xf32>,
    return
  }
  func.func @transform_0(%arg0: i32, %arg1: i32) -> (i32, i32) {
    %c1_i32 = arith.constant 1 : i32
    %0 = arith.muli %arg0, %c1_i32 : i32
    %1 = arith.addi %0, %arg1 : i32
    %c0_i32 = arith.constant 0 : i32
    %c0_i32_0 = arith.constant 0 : i32
    return %1, %c0_i32 : i32, i32
  }
  func.func @transform_1(%arg0: i32, %arg1: i32) -> (i32, i32) {
    %c1_i32 = arith.constant 1 : i32
    %0 = arith.muli %arg0, %c1_i32 : i32
    %1 = arith.addi %0, %arg1 : i32
    %c0_i32 = arith.constant 0 : i32
    %c0_i32_0 = arith.constant 0 : i32
    return %1, %c0_i32 : i32, i32
  }
  func.func @transform_2(%arg0: i32, %arg1: i32) -> (i32, i32, i32) {
    %c0_i32 = arith.constant 0 : i32
    %c0_i32_0 = arith.constant 0 : i32
    %c0_i32_1 = arith.constant 0 : i32
    return %arg0, %c0_i32, %c0_i32_0 : i32, i32, i32
  }
  func.func @transform_3(%arg0: i32, %arg1: i32) -> (i32, i32, i32) {
    %c0_i32 = arith.constant 0 : i32
    %c0_i32_0 = arith.constant 0 : i32
    %c0_i32_1 = arith.constant 0 : i32
    return %arg0, %c0_i32, %c0_i32_0 : i32, i32, i32
  }
  func.func @transform_4(%arg0: i32, %arg1: i32) -> (i32, i32, i32) {
    %c0_i32 = arith.constant 0 : i32
    %c0_i32_0 = arith.constant 0 : i32
    %c0_i32_1 = arith.constant 0 : i32
    return %arg0, %c0_i32, %c0_i32_0 : i32, i32, i32
  }
}

</mosaic_0001>

<bundles_post_ra>
// kernel: tpu_custom_call.1
= control target key start
LH: loop header
LB: loop body
LE: loop exit
PB: predicated region body
PF: predicated region fallthrough
CT: control target
= control target key end

     0   :  { %10 = vsyncpa [#allocation3], 0  ;;  %s336_s0 = inlined_call_operand.hbm [shape: u32[1,32], index: 0, kind: input, shape index: {}]   ;;  %s337_s1 = inlined_call_operand.hbm [shape: s8[1,32], index: 1, kind: input, shape index: {}]   ;;  %s338_s2 = inlined_call_operand.hbm [shape: f32[1,8,32], index: 2, kind: output, shape index: {0}]   ;;  %s339_s3 = inlined_call_operand.hbm [shape: f32[1,8,32], index: 3, kind: output, shape index: {1}]   ;;  %s340_s4 = inlined_call_operand.hbm [shape: f32[1,8,32], index: 4, kind: output, shape index: {2}]  }
   0x1   :  { %11 = vsyncpa [#allocation6], 0 }
   0x2   :  { %12 = vsyncpa [#allocation4], 0 }
   0x3   :  { %13 = vsyncpa [#allocation9], 0  ;;  %s21_s17 = sshll.u32 %s336_s0, 4  ;;  %s284_s18 = smov [#allocation2]   ;;  %s22_s17 = int_to_ptr.hbm [resolvable:$true] %s21_s17 }
   0x4   :  { %s23_s19 = sshll.u32 %s284_s18, 4  ;;  %s34_s22 = sshll.u32 %s337_s1, 4  ;;  %s24_s19 = int_to_ptr.vmem [resolvable:$true] %s23_s19  ;;  %s35_s22 = int_to_ptr.hbm [resolvable:$true] %s34_s22 }
   0x5   :  { %26 = dma.hbm_to_vmem [thread:$0]  %s22_s17, 16, %s24_s19, [#allocation3]  }
   0x6   :  { %s285_s23 = smov [#allocation5]  }
   0x7   :  { %s36_s24 = sshll.u32 %s285_s23, 4  ;;  %s37_s24 = int_to_ptr.vmem [resolvable:$true] %s36_s24 }
   0x8   :  { %39 = dma.hbm_to_vmem [thread:$0]  %s35_s22, 16, %s37_s24, [#allocation6]  }
   0x9   :  { %276 = dma.done.wait [#allocation3], 16  }
   0xa   :  { %277 = vsyncadd [#allocation3], 4294967280 }
   0xb   :  { %278 = dma.done.wait [#allocation6], 16  }
   0xc   :  { %279 = vsyncadd [#allocation6], 4294967280  ;;  %vm54_vm0 = vcmask 261120   ;;  %v286_v0 = vmov 0.0   ;;  %v58_v1 = vld [vmem:[#allocation2] sm:$0x1] }
   0xd   :  { %56 = vst.msk [vmem:[#allocation8] sm:$0xff] %vm54_vm0, %v286_v0  ;;  %v63_v2 = vld [vmem:[#allocation5] sm:$0x1]  ;;  %v59_v3 = vshll.u32 %v58_v1, 16  ;;  %v61_v4 = vand.u32 4294901760, %v58_v1  ;;  %s287_s0 = smov [#allocation7]  }
   0xe   :  { %55 = vst.msk [vmem:[#allocation7] sm:$0xff] %vm54_vm0, %v286_v0  ;;  %v64_v5 = vunpack.c.0.s8 %v63_v2  ;;  %s101_s1 = sshll.u32 %s287_s0, 4  ;;  %s103_s27 = sshll.u32 %s338_s2, 4  ;;  %s102_s1 = int_to_ptr.vmem [resolvable:$true] %s101_s1  ;;  %s104_s27 = int_to_ptr.hbm [resolvable:$true] %s103_s27 }
   0xf   :  { %57 = vst.msk [vmem:[#allocation10] sm:$0xff] %vm54_vm0, %v286_v0  ;;  %v66_v7 = vsub.f32 %v59_v3, %v61_v4  ;;  %s288_s28 = smov [#allocation8]   ;;  %s114_s6 = sshll.u32 %s339_s3, 4  ;;  %s115_s6 = int_to_ptr.hbm [resolvable:$true] %s114_s6 }
  0x10   :  { %v65_v6 = vcvt.s32.f32 %v64_v5  ;;  %s112_s29 = sshll.u32 %s288_s28, 4  ;;  %s289_s7 = smov [#allocation10]   ;;  %s113_s29 = int_to_ptr.vmem [resolvable:$true] %s112_s29 }
  0x11   :  { %s123_s8 = sshll.u32 %s289_s7, 4  ;;  %s125_s11 = sshll.u32 %s340_s4, 4  ;;  %s124_s8 = int_to_ptr.vmem [resolvable:$true] %s123_s8  ;;  %s126_s11 = int_to_ptr.hbm [resolvable:$true] %s125_s11 }
  0x12   :  { %v67_v8 = vmul.f32 2.0, %v65_v6  ;;  %v93_v10 = vperm.slane %v65_v6, 0 }
  0x14   :  { %v145_v9 = vadd.f32 -1.0, %v67_v8  ;;  %v86_v26 = vld [vmem:[#allocation8] sm:$0xff] }
  0x15   :  { %v80_v23 = vld [vmem:[#allocation7] sm:$0xff] }
  0x16   :  { %v69_v11 = vmul.f32 %v145_v9, %v66_v7  ;;  %v91_v12 = vld [vmem:[#allocation10] sm:$0xff] }
  0x17   :  { %v94_v13 = vadd.f32 %v93_v10, %v91_v12 }
  0x18   :  { %v71_v14 = vand.u32 2147483647, %v69_v11  ;;  %v70_v19 = vmax.f32 %v69_v11, 0.0 }
  0x19   :  { %95 = vst.msk [vmem:[#allocation10] sm:$0xff] %vm54_vm0, %v94_v13 }
  0x1a   :  { %v72_v15 = vsub.f32 0.0, %v71_v14 }
  0x1c   :  { %v73_v16 = vmul.f32 1.442695, %v72_v15 }
  0x1e   :  { %152 = vpow2.f32 %v73_v16 }
  0x24   :  { %v153_v17 = vpop.eup %152 }
  0x25   :  { %v75_v18 = vadd.f32 1.0, %v153_v17 }
  0x27   :  { %154 = vlog2.f32 %v75_v18 }
  0x2d   :  { %v155_v20 = vpop.eup %154 }
  0x2e   :  { %v77_v21 = vmul.f32 0.6931472, %v155_v20 }
  0x30   :  { %v78_v22 = vadd.f32 %v77_v21, %v70_v19 }
  0x32   :  { %v79_v24 = vmul.f32 %v78_v22, %v65_v6  ;;  %v82_v25 = vperm.slane %v78_v22, 0 }
  0x34   :  { %v88_v27 = vperm.slane %v79_v24, 0  ;;  %v83_v28 = vadd.f32 %v82_v25, %v80_v23 }
  0x36   :  { %v89_v29 = vadd.f32 %v88_v27, %v86_v26  ;;  %85 = vst.msk [vmem:[#allocation7] sm:$0xff] %vm54_vm0, %v83_v28 }
  0x37   :  { %106 = dma.vmem_to_hbm [thread:$0]  %s102_s1, 128, %s104_s27, [#allocation4]  }
  0x38   :  { %90 = vst.msk [vmem:[#allocation8] sm:$0xff] %vm54_vm0, %v89_v29 }
  0x39   :  { %117 = dma.vmem_to_hbm [thread:$0]  %s113_s29, 128, %s115_s6, [#allocation9]  }
  0x3a   :  { %128 = dma.vmem_to_hbm [thread:$0]  %s124_s8, 128, %s126_s11, [#allocation9]  }
  0x3b   :  { %280 = dma.done.wait [#allocation4], 128  }
  0x3c   :  { %281 = vsyncadd [#allocation4], 4294967168 }
  0x3d   :  { %282 = dma.done.wait [#allocation9], 256  }
  0x3e   :  { %283 = vsyncadd [#allocation9], 4294967040 }
  0x3f   :  { %141 = vsyncpa [#allocation3], 1 }
  0x40   :  { %142 = vsyncpa [#allocation6], 1 }
  0x41   :  { %143 = vsyncpa [#allocation4], 1 }
  0x42   :  { %144 = vsyncpa [#allocation9], 1 }

</bundles_post_ra>
